<compile_context>
chip_gen: v6e
topology: v6e:2x2x1
jax: 0.10.0
libtpu: 0.0.40
codegen_flags: <defaults>
</compile_context>

<pallas_src>
import functools

import jax
import jax.numpy as jnp
from jax import lax
from jax.experimental import pallas as pl
from jax.experimental.pallas import tpu as pltpu


def lstm_linear_kernel(x_ref, h0_ref, c0_ref, wih_ref, whh_ref, b_ref,
                       wfc_ref, bfc_ref,
                       out_ref, hn_ref, cn_ref, *, seq_len):
    T = seq_len
    B, H = h0_ref.shape

    # --- hoist all weight / bias reads out of the recurrence ---------------
    wih = wih_ref[...]          # (I, 4H)  bf16 = torch weight_ih_l0.T
    whh = whh_ref[...]          # (H, 4H)  bf16 = torch weight_hh_l0.T
    b_all = b_ref[...]          # (1, 4H)  f32  = b_ih + b_hh
    wfc = wfc_ref[...]          # (H, O)   bf16 = torch fc.weight.T
    bfc = bfc_ref[...]          # (1, O)   f32

    # --- input projection for every timestep: one matmul, off the chain ----
    # x_ref is the time-major-flattened input (T*B, I), bf16.
    xp = jnp.dot(x_ref[...], wih, preferred_element_type=jnp.float32) + b_all

    # --- serial LSTM recurrence, fully unrolled (T small & static) ---------
    h = h0_ref[...].astype(jnp.float32)      # (B, H) f32 state
    c = c0_ref[...].astype(jnp.float32)      # (B, H) f32 state
    hs_list = []                             # register-resident hidden slab
    for t in range(T):
        gates = xp[t * B:(t + 1) * B, :] + jnp.dot(
            h.astype(whh.dtype), whh,
            preferred_element_type=jnp.float32)              # (B, 4H) f32
        # Two full-vreg EUP pushes instead of four partial ones; PyTorch gate
        # order is [input, forget, cell(g), output].
        sig = jax.nn.sigmoid(gates)
        tnh = jnp.tanh(gates)
        i_g = sig[:, 0 * H:1 * H]
        f_g = sig[:, 1 * H:2 * H]
        g_g = tnh[:, 2 * H:3 * H]
        o_g = sig[:, 3 * H:4 * H]
        c = f_g * c + i_g * g_g              # f32 cell update
        h = o_g * jnp.tanh(c)                # f32 hidden update
        hs_list.append(h)

    # --- batched Linear head: one matmul + one contiguous output store -----
    hs = jnp.concatenate(hs_list, axis=0)    # (T*B, H), stays in vregs
    out = jnp.dot(hs.astype(wfc.dtype), wfc,
                  preferred_element_type=jnp.float32) + bfc
    out_ref[...] = out.astype(out_ref.dtype)             # (T*B, O)
    hn_ref[...] = h.astype(hn_ref.dtype)
    cn_ref[...] = c.astype(cn_ref.dtype)


def lstm_linear(x, init_h, init_c, params):
    """x: (B, T, I) batch_first; init_h/init_c: (1, B, H) (PyTorch layout).

    Returns (out (B, T, O), (h_n (1, B, H), c_n (1, B, H))).
    """
    w_ih, w_hh, b_ih, b_hh, w_fc, b_fc = params          # PyTorch-shaped
    B, T, I = x.shape
    H = init_h.shape[-1]
    O = w_fc.shape[0]

    # Layout plumbing only: time-major, flattened to 2-D, matmul operands in
    # bf16 (MXU native), biases / states in f32.
    x2d = jnp.transpose(x, (1, 0, 2)).reshape(T * B, I).astype(jnp.bfloat16)
    args = (x2d,
            init_h[0].astype(jnp.float32),
            init_c[0].astype(jnp.float32),
            w_ih.T.astype(jnp.bfloat16),
            w_hh.T.astype(jnp.bfloat16),
            (b_ih + b_hh)[None, :].astype(jnp.float32),
            w_fc.T.astype(jnp.bfloat16),
            b_fc[None, :].astype(jnp.float32))

    vmem = pl.BlockSpec(memory_space=pltpu.MemorySpace.VMEM)
    out2d, hn, cn = pl.pallas_call(
        functools.partial(lstm_linear_kernel, seq_len=T),
        out_shape=(jax.ShapeDtypeStruct((T * B, O), x.dtype),
                   jax.ShapeDtypeStruct((B, H), x.dtype),
                   jax.ShapeDtypeStruct((B, H), x.dtype)),
        in_specs=[vmem] * len(args),
        out_specs=(vmem, vmem, vmem),
    )(*args)

    out = jnp.transpose(out2d.reshape(T, B, O), (1, 0, 2))
    return out, (hn[None], cn[None])


def lstm_linear_ref(x, init_h, init_c, params):
    """Pure-JAX f32 reference mirroring the PyTorch LSTM + Linear forward."""
    w_ih, w_hh, b_ih, b_hh, w_fc, b_fc = params

    def step(carry, x_t):
        h, c = carry
        gates = x_t @ w_ih.T + b_ih + h @ w_hh.T + b_hh
        i_g, f_g, g_g, o_g = jnp.split(gates, 4, axis=-1)
        i_g = jax.nn.sigmoid(i_g)
        f_g = jax.nn.sigmoid(f_g)
        g_g = jnp.tanh(g_g)
        o_g = jax.nn.sigmoid(o_g)
        c = f_g * c + i_g * g_g
        h = o_g * jnp.tanh(c)
        return (h, c), h

    (h_n, c_n), hs = lax.scan(step, (init_h[0], init_c[0]),
                              jnp.transpose(x, (1, 0, 2)))
    out = jnp.transpose(hs, (1, 0, 2)) @ w_fc.T + b_fc
    return out, (h_n[None], c_n[None])


if __name__ == "__main__":
    # Small shapes consistent with the module: batch=2, input=4, seq=8,
    # hidden=32, output=4.
    B, T, I, H, O = 2, 8, 4, 32, 4

    key = jax.random.PRNGKey(0)
    ks = jax.random.split(key, 9)
    bound = 1.0 / jnp.sqrt(jnp.float32(H))   # torch.nn.LSTM / Linear init range
    w_ih = jax.random.uniform(ks[0], (4 * H, I), jnp.float32, -bound, bound)   # weight_ih_l0
    w_hh = jax.random.uniform(ks[1], (4 * H, H), jnp.float32, -bound, bound)   # weight_hh_l0
    b_ih = jax.random.uniform(ks[2], (4 * H,), jnp.float32, -bound, bound)     # bias_ih_l0
    b_hh = jax.random.uniform(ks[3], (4 * H,), jnp.float32, -bound, bound)     # bias_hh_l0
    w_fc = jax.random.uniform(ks[4], (O, H), jnp.float32, -bound, bound)       # fc.weight
    b_fc = jax.random.uniform(ks[5], (O,), jnp.float32, -bound, bound)         # fc.bias
    params = (w_ih, w_hh, b_ih, b_hh, w_fc, b_fc)

    x = jax.random.normal(ks[6], (B, T, I), jnp.float32)          # batch_first input
    init_h = jax.random.normal(ks[7], (1, B, H), jnp.float32)     # (num_layers, B, H)
    init_c = jax.random.normal(ks[8], (1, B, H), jnp.float32)     # (num_layers, B, H)

    out, (hn, cn) = lstm_linear(x, init_h, init_c, params)
    out = jax.block_until_ready(out)

    ref_out, (ref_hn, ref_cn) = lstm_linear_ref(x, init_h, init_c, params)
    assert out.shape == (B, T, O), out.shape
    assert hn.shape == (1, B, H) and cn.shape == (1, B, H), (hn.shape, cn.shape)
    # Kernel uses bf16 MXU operands with f32 accumulation; compare against the
    # f32 reference with correspondingly loosened tolerances.
    tol = dict(rtol=1e-1, atol=1e-1)
    assert jnp.allclose(out, ref_out, **tol), float(jnp.abs(out - ref_out).max())
    assert jnp.allclose(hn, ref_hn, **tol), float(jnp.abs(hn - ref_hn).max())
    assert jnp.allclose(cn, ref_cn, **tol), float(jnp.abs(cn - ref_cn).max())

    print("KERNEL_OK")
</pallas_src>

<mosaic_0001>
module attributes {stable_mosaic.version = 11 : i64} {
  func.func @lstm_linear_kernel(%arg0: memref<16x4xbf16, #tpu.memory_space<vmem>>, %arg1: memref<2x32xf32, #tpu.memory_space<vmem>>, %arg2: memref<2x32xf32, #tpu.memory_space<vmem>>, %arg3: memref<4x128xbf16, #tpu.memory_space<vmem>>, %arg4: memref<32x128xbf16, #tpu.memory_space<vmem>>, %arg5: memref<1x128xf32, #tpu.memory_space<vmem>>, %arg6: memref<32x4xbf16, #tpu.memory_space<vmem>>, %arg7: memref<1x4xf32, #tpu.memory_space<vmem>>, %arg8: memref<16x4xf32, #tpu.memory_space<vmem>>, %arg9: memref<2x32xf32, #tpu.memory_space<vmem>>, %arg10: memref<2x32xf32, #tpu.memory_space<vmem>>) attributes {dimension_semantics = [], scalar_prefetch = 0 : i64, scratch_operands = 0 : i64, tpu.core_type = #tpu.core_type<tc>} {
    %c0 = arith.constant 0 : index
    %c0_0 = arith.constant 0 : index
    %0 = vector.load %arg3[%c0, %c0_0] : memref<4x128xbf16, #tpu.memory_space<vmem>>, vector<4x128xbf16>
    %c0_1 = arith.constant 0 : index
    %c0_2 = arith.constant 0 : index
    %1 = vector.load %arg4[%c0_1, %c0_2] : memref<32x128xbf16, #tpu.memory_space<vmem>>, vector<32x128xbf16>
    %c0_3 = arith.constant 0 : index
    %c0_4 = arith.constant 0 : index
    %2 = vector.load %arg5[%c0_3, %c0_4] : memref<1x128xf32, #tpu.memory_space<vmem>>, vector<1x128xf32>
    %c0_5 = arith.constant 0 : index
    %c0_6 = arith.constant 0 : index
    %3 = vector.load %arg6[%c0_5, %c0_6] : memref<32x4xbf16, #tpu.memory_space<vmem>>, vector<32x4xbf16>
    %c0_7 = arith.constant 0 : index
    %c0_8 = arith.constant 0 : index
    %4 = vector.load %arg7[%c0_7, %c0_8] : memref<1x4xf32, #tpu.memory_space<vmem>>, vector<1x4xf32>
    %c0_9 = arith.constant 0 : index
    %c0_10 = arith.constant 0 : index
    %5 = vector.load %arg0[%c0_9, %c0_10] : memref<16x4xbf16, #tpu.memory_space<vmem>>, vector<16x4xbf16>
    %cst = arith.constant dense<0.000000e+00> : vector<16x128xf32>
    %6 = tpu.matmul %5, %0, %cst {dimension_numbers = #tpu.dot_dimension_numbers<[1], [0], [0], [1], [0, 0, 1, 1], [], []>} : vector<16x4xbf16>, vector<4x128xbf16>, vector<16x128xf32> -> vector<16x128xf32>
    %7 = vector.broadcast %2 : vector<1x128xf32> to vector<16x128xf32>
    %8 = arith.addf %6, %7 : vector<16x128xf32>
    %c0_11 = arith.constant 0 : index
    %c0_12 = arith.constant 0 : index
    %9 = vector.load %arg1[%c0_11, %c0_12] : memref<2x32xf32, #tpu.memory_space<vmem>>, vector<2x32xf32>
    %c0_13 = arith.constant 0 : index
    %c0_14 = arith.constant 0 : index
    %10 = vector.load %arg2[%c0_13, %c0_14] : memref<2x32xf32, #tpu.memory_space<vmem>>, vector<2x32xf32>
    %11 = vector.extract_strided_slice %8 {offsets = [0, 0], sizes = [2, 128], strides = [1, 1]} : vector<16x128xf32> to vector<2x128xf32>
    %12 = arith.truncf %9 : vector<2x32xf32> to vector<2x32xbf16>
    %cst_15 = arith.constant dense<0.000000e+00> : vector<2x128xf32>
    %13 = tpu.matmul %12, %1, %cst_15 {dimension_numbers = #tpu.dot_dimension_numbers<[1], [0], [0], [1], [0, 0, 1, 1], [], []>} : vector<2x32xbf16>, vector<32x128xbf16>, vector<2x128xf32> -> vector<2x128xf32>
    %14 = arith.addf %11, %13 : vector<2x128xf32>
    %15 = arith.negf %14 : vector<2x128xf32>
    %16 = math.exp %15 : vector<2x128xf32>
    %cst_16 = arith.constant 1.000000e+00 : f32
    %17 = vector.broadcast %cst_16 : f32 to vector<2x128xf32>
    %18 = arith.addf %17, %16 : vector<2x128xf32>
    %19 = arith.divf %17, %18 : vector<2x128xf32>
    %20 = math.tanh %14 : vector<2x128xf32>
    %21 = vector.extract_strided_slice %19 {offsets = [0, 0], sizes = [2, 32], strides = [1, 1]} : vector<2x128xf32> to vector<2x32xf32>
    %22 = vector.extract_strided_slice %19 {offsets = [0, 32], sizes = [2, 32], strides = [1, 1]} : vector<2x128xf32> to vector<2x32xf32>
    %23 = vector.extract_strided_slice %20 {offsets = [0, 64], sizes = [2, 32], strides = [1, 1]} : vector<2x128xf32> to vector<2x32xf32>
    %24 = vector.extract_strided_slice %19 {offsets = [0, 96], sizes = [2, 32], strides = [1, 1]} : vector<2x128xf32> to vector<2x32xf32>
    %25 = arith.mulf %22, %10 : vector<2x32xf32>
    %26 = arith.mulf %21, %23 : vector<2x32xf32>
    %27 = arith.addf %25, %26 : vector<2x32xf32>
    %28 = math.tanh %27 : vector<2x32xf32>
    %29 = arith.mulf %24, %28 : vector<2x32xf32>
    %30 = vector.extract_strided_slice %8 {offsets = [2, 0], sizes = [2, 128], strides = [1, 1]} : vector<16x128xf32> to vector<2x128xf32>
    %31 = arith.truncf %29 : vector<2x32xf32> to vector<2x32xbf16>
    %cst_17 = arith.constant dense<0.000000e+00> : vector<2x128xf32>
    %32 = tpu.matmul %31, %1, %cst_17 {dimension_numbers = #tpu.dot_dimension_numbers<[1], [0], [0], [1], [0, 0, 1, 1], [], []>} : vector<2x32xbf16>, vector<32x128xbf16>, vector<2x128xf32> -> vector<2x128xf32>
    %33 = arith.addf %30, %32 : vector<2x128xf32>
    %34 = arith.negf %33 : vector<2x128xf32>
    %35 = math.exp %34 : vector<2x128xf32>
    %cst_18 = arith.constant 1.000000e+00 : f32
    %36 = vector.broadcast %cst_18 : f32 to vector<2x128xf32>
    %37 = arith.addf %36, %35 : vector<2x128xf32>
    %38 = arith.divf %36, %37 : vector<2x128xf32>
    %39 = math.tanh %33 : vector<2x128xf32>
    %40 = vector.extract_strided_slice %38 {offsets = [0, 0], sizes = [2, 32], strides = [1, 1]} : vector<2x128xf32> to vector<2x32xf32>
    %41 = vector.extract_strided_slice %38 {offsets = [0, 32], sizes = [2, 32], strides = [1, 1]} : vector<2x128xf32> to vector<2x32xf32>
    %42 = vector.extract_strided_slice %39 {offsets = [0, 64], sizes = [2, 32], strides = [1, 1]} : vector<2x128xf32> to vector<2x32xf32>
    %43 = vector.extract_strided_slice %38 {offsets = [0, 96], sizes = [2, 32], strides = [1, 1]} : vector<2x128xf32> to vector<2x32xf32>
    %44 = arith.mulf %41, %27 : vector<2x32xf32>
    %45 = arith.mulf %40, %42 : vector<2x32xf32>
    %46 = arith.addf %44, %45 : vector<2x32xf32>
    %47 = math.tanh %46 : vector<2x32xf32>
    %48 = arith.mulf %43, %47 : vector<2x32xf32>
    %49 = vector.extract_strided_slice %8 {offsets = [4, 0], sizes = [2, 128], strides = [1, 1]} : vector<16x128xf32> to vector<2x128xf32>
    %50 = arith.truncf %48 : vector<2x32xf32> to vector<2x32xbf16>
    %cst_19 = arith.constant dense<0.000000e+00> : vector<2x128xf32>
    %51 = tpu.matmul %50, %1, %cst_19 {dimension_numbers = #tpu.dot_dimension_numbers<[1], [0], [0], [1], [0, 0, 1, 1], [], []>} : vector<2x32xbf16>, vector<32x128xbf16>, vector<2x128xf32> -> vector<2x128xf32>
    %52 = arith.addf %49, %51 : vector<2x128xf32>
    %53 = arith.negf %52 : vector<2x128xf32>
    %54 = math.exp %53 : vector<2x128xf32>
    %cst_20 = arith.constant 1.000000e+00 : f32
    %55 = vector.broadcast %cst_20 : f32 to vector<2x128xf32>
    %56 = arith.addf %55, %54 : vector<2x128xf32>
    %57 = arith.divf %55, %56 : vector<2x128xf32>
    %58 = math.tanh %52 : vector<2x128xf32>
    %59 = vector.extract_strided_slice %57 {offsets = [0, 0], sizes = [2, 32], strides = [1, 1]} : vector<2x128xf32> to vector<2x32xf32>
    %60 = vector.extract_strided_slice %57 {offsets = [0, 32], sizes = [2, 32], strides = [1, 1]} : vector<2x128xf32> to vector<2x32xf32>
    %61 = vector.extract_strided_slice %58 {offsets = [0, 64], sizes = [2, 32], strides = [1, 1]} : vector<2x128xf32> to vector<2x32xf32>
    %62 = vector.extract_strided_slice %57 {offsets = [0, 96], sizes = [2, 32], strides = [1, 1]} : vector<2x128xf32> to vector<2x32xf32>
    %63 = arith.mulf %60, %46 : vector<2x32xf32>
    %64 = arith.mulf %59, %61 : vector<2x32xf32>
    %65 = arith.addf %63, %64 : vector<2x32xf32>
    %66 = math.tanh %65 : vector<2x32xf32>
    %67 = arith.mulf %62, %66 : vector<2x32xf32>
    %68 = vector.extract_strided_slice %8 {offsets = [6, 0], sizes = [2, 128], strides = [1, 1]} : vector<16x128xf32> to vector<2x128xf32>
    %69 = arith.truncf %67 : vector<2x32xf32> to vector<2x32xbf16>
    %cst_21 = arith.constant dense<0.000000e+00> : vector<2x128xf32>
    %70 = tpu.matmul %69, %1, %cst_21 {dimension_numbers = #tpu.dot_dimension_numbers<[1], [0], [0], [1], [0, 0, 1, 1], [], []>} : vector<2x32xbf16>, vector<32x128xbf16>, vector<2x128xf32> -> vector<2x128xf32>
    %71 = arith.addf %68, %70 : vector<2x128xf32>
    %72 = arith.negf %71 : vector<2x128xf32>
    %73 = math.exp %72 : vector<2x128xf32>
    %cst_22 = arith.constant 1.000000e+00 : f32
    %74 = vector.broadcast %cst_22 : f32 to vector<2x128xf32>
    %75 = arith.addf %74, %73 : vector<2x128xf32>
    %76 = arith.divf %74, %75 : vector<2x128xf32>
    %77 = math.tanh %71 : vector<2x128xf32>
    %78 = vector.extract_strided_slice %76 {offsets = [0, 0], sizes = [2, 32], strides = [1, 1]} : vector<2x128xf32> to vector<2x32xf32>
    %79 = vector.extract_strided_slice %76 {offsets = [0, 32], sizes = [2, 32], strides = [1, 1]} : vector<2x128xf32> to vector<2x32xf32>
    %80 = vector.extract_strided_slice %77 {offsets = [0, 64], sizes = [2, 32], strides = [1, 1]} : vector<2x128xf32> to vector<2x32xf32>
    %81 = vector.extract_strided_slice %76 {offsets = [0, 96], sizes = [2, 32], strides = [1, 1]} : vector<2x128xf32> to vector<2x32xf32>
    %82 = arith.mulf %79, %65 : vector<2x32xf32>
    %83 = arith.mulf %78, %80 : vector<2x32xf32>
    %84 = arith.addf %82, %83 : vector<2x32xf32>
    %85 = math.tanh %84 : vector<2x32xf32>
    %86 = arith.mulf %81, %85 : vector<2x32xf32>
    %87 = vector.extract_strided_slice %8 {offsets = [8, 0], sizes = [2, 128], strides = [1, 1]} : vector<16x128xf32> to vector<2x128xf32>
    %88 = arith.truncf %86 : vector<2x32xf32> to vector<2x32xbf16>
    %cst_23 = arith.constant dense<0.000000e+00> : vector<2x128xf32>
    %89 = tpu.matmul %88, %1, %cst_23 {dimension_numbers = #tpu.dot_dimension_numbers<[1], [0], [0], [1], [0, 0, 1, 1], [], []>} : vector<2x32xbf16>, vector<32x128xbf16>, vector<2x128xf32> -> vector<2x128xf32>
    %90 = arith.addf %87, %89 : vector<2x128xf32>
    %91 = arith.negf %90 : vector<2x128xf32>
    %92 = math.exp %91 : vector<2x128xf32>
    %cst_24 = arith.constant 1.000000e+00 : f32
    %93 = vector.broadcast %cst_24 : f32 to vector<2x128xf32>
    %94 = arith.addf %93, %92 : vector<2x128xf32>
    %95 = arith.divf %93, %94 : vector<2x128xf32>
    %96 = math.tanh %90 : vector<2x128xf32>
    %97 = vector.extract_strided_slice %95 {offsets = [0, 0], sizes = [2, 32], strides = [1, 1]} : vector<2x128xf32> to vector<2x32xf32>
    %98 = vector.extract_strided_slice %95 {offsets = [0, 32], sizes = [2, 32], strides = [1, 1]} : vector<2x128xf32> to vector<2x32xf32>
    %99 = vector.extract_strided_slice %96 {offsets = [0, 64], sizes = [2, 32], strides = [1, 1]} : vector<2x128xf32> to vector<2x32xf32>
    %100 = vector.extract_strided_slice %95 {offsets = [0, 96], sizes = [2, 32], strides = [1, 1]} : vector<2x128xf32> to vector<2x32xf32>
    %101 = arith.mulf %98, %84 : vector<2x32xf32>
    %102 = arith.mulf %97, %99 : vector<2x32xf32>
    %103 = arith.addf %101, %102 : vector<2x32xf32>
    %104 = math.tanh %103 : vector<2x32xf32>
    %105 = arith.mulf %100, %104 : vector<2x32xf32>
    %106 = vector.extract_strided_slice %8 {offsets = [10, 0], sizes = [2, 128], strides = [1, 1]} : vector<16x128xf32> to vector<2x128xf32>
    %107 = arith.truncf %105 : vector<2x32xf32> to vector<2x32xbf16>
    %cst_25 = arith.constant dense<0.000000e+00> : vector<2x128xf32>
    %108 = tpu.matmul %107, %1, %cst_25 {dimension_numbers = #tpu.dot_dimension_numbers<[1], [0], [0], [1], [0, 0, 1, 1], [], []>} : vector<2x32xbf16>, vector<32x128xbf16>, vector<2x128xf32> -> vector<2x128xf32>
    %109 = arith.addf %106, %108 : vector<2x128xf32>
    %110 = arith.negf %109 : vector<2x128xf32>
    %111 = math.exp %110 : vector<2x128xf32>
    %cst_26 = arith.constant 1.000000e+00 : f32
    %112 = vector.broadcast %cst_26 : f32 to vector<2x128xf32>
    %113 = arith.addf %112, %111 : vector<2x128xf32>
    %114 = arith.divf %112, %113 : vector<2x128xf32>
    %115 = math.tanh %109 : vector<2x128xf32>
    %116 = vector.extract_strided_slice %114 {offsets = [0, 0], sizes = [2, 32], strides = [1, 1]} : vector<2x128xf32> to vector<2x32xf32>
    %117 = vector.extract_strided_slice %114 {offsets = [0, 32], sizes = [2, 32], strides = [1, 1]} : vector<2x128xf32> to vector<2x32xf32>
    %118 = vector.extract_strided_slice %115 {offsets = [0, 64], sizes = [2, 32], strides = [1, 1]} : vector<2x128xf32> to vector<2x32xf32>
    %119 = vector.extract_strided_slice %114 {offsets = [0, 96], sizes = [2, 32], strides = [1, 1]} : vector<2x128xf32> to vector<2x32xf32>
    %120 = arith.mulf %117, %103 : vector<2x32xf32>
    %121 = arith.mulf %116, %118 : vector<2x32xf32>
    %122 = arith.addf %120, %121 : vector<2x32xf32>
    %123 = math.tanh %122 : vector<2x32xf32>
    %124 = arith.mulf %119, %123 : vector<2x32xf32>
    %125 = vector.extract_strided_slice %8 {offsets = [12, 0], sizes = [2, 128], strides = [1, 1]} : vector<16x128xf32> to vector<2x128xf32>
    %126 = arith.truncf %124 : vector<2x32xf32> to vector<2x32xbf16>
    %cst_27 = arith.constant dense<0.000000e+00> : vector<2x128xf32>
    %127 = tpu.matmul %126, %1, %cst_27 {dimension_numbers = #tpu.dot_dimension_numbers<[1], [0], [0], [1], [0, 0, 1, 1], [], []>} : vector<2x32xbf16>, vector<32x128xbf16>, vector<2x128xf32> -> vector<2x128xf32>
    %128 = arith.addf %125, %127 : vector<2x128xf32>
    %129 = arith.negf %128 : vector<2x128xf32>
    %130 = math.exp %129 : vector<2x128xf32>
    %cst_28 = arith.constant 1.000000e+00 : f32
    %131 = vector.broadcast %cst_28 : f32 to vector<2x128xf32>
    %132 = arith.addf %131, %130 : vector<2x128xf32>
    %133 = arith.divf %131, %132 : vector<2x128xf32>
    %134 = math.tanh %128 : vector<2x128xf32>
    %135 = vector.extract_strided_slice %133 {offsets = [0, 0], sizes = [2, 32], strides = [1, 1]} : vector<2x128xf32> to vector<2x32xf32>
    %136 = vector.extract_strided_slice %133 {offsets = [0, 32], sizes = [2, 32], strides = [1, 1]} : vector<2x128xf32> to vector<2x32xf32>
    %137 = vector.extract_strided_slice %134 {offsets = [0, 64], sizes = [2, 32], strides = [1, 1]} : vector<2x128xf32> to vector<2x32xf32>
    %138 = vector.extract_strided_slice %133 {offsets = [0, 96], sizes = [2, 32], strides = [1, 1]} : vector<2x128xf32> to vector<2x32xf32>
    %139 = arith.mulf %136, %122 : vector<2x32xf32>
    %140 = arith.mulf %135, %137 : vector<2x32xf32>
    %141 = arith.addf %139, %140 : vector<2x32xf32>
    %142 = math.tanh %141 : vector<2x32xf32>
    %143 = arith.mulf %138, %142 : vector<2x32xf32>
    %144 = vector.extract_strided_slice %8 {offsets = [14, 0], sizes = [2, 128], strides = [1, 1]} : vector<16x128xf32> to vector<2x128xf32>
    %145 = arith.truncf %143 : vector<2x32xf32> to vector<2x32xbf16>
    %cst_29 = arith.constant dense<0.000000e+00> : vector<2x128xf32>
    %146 = tpu.matmul %145, %1, %cst_29 {dimension_numbers = #tpu.dot_dimension_numbers<[1], [0], [0], [1], [0, 0, 1, 1], [], []>} : vector<2x32xbf16>, vector<32x128xbf16>, vector<2x128xf32> -> vector<2x128xf32>
    %147 = arith.addf %144, %146 : vector<2x128xf32>
    %148 = arith.negf %147 : vector<2x128xf32>
    %149 = math.exp %148 : vector<2x128xf32>
    %cst_30 = arith.constant 1.000000e+00 : f32
    %150 = vector.broadcast %cst_30 : f32 to vector<2x128xf32>
    %151 = arith.addf %150, %149 : vector<2x128xf32>
    %152 = arith.divf %150, %151 : vector<2x128xf32>
    %153 = math.tanh %147 : vector<2x128xf32>
    %154 = vector.extract_strided_slice %152 {offsets = [0, 0], sizes = [2, 32], strides = [1, 1]} : vector<2x128xf32> to vector<2x32xf32>
    %155 = vector.extract_strided_slice %152 {offsets = [0, 32], sizes = [2, 32], strides = [1, 1]} : vector<2x128xf32> to vector<2x32xf32>
    %156 = vector.extract_strided_slice %153 {offsets = [0, 64], sizes = [2, 32], strides = [1, 1]} : vector<2x128xf32> to vector<2x32xf32>
    %157 = vector.extract_strided_slice %152 {offsets = [0, 96], sizes = [2, 32], strides = [1, 1]} : vector<2x128xf32> to vector<2x32xf32>
    %158 = arith.mulf %155, %141 : vector<2x32xf32>
    %159 = arith.mulf %154, %156 : vector<2x32xf32>
    %160 = arith.addf %158, %159 : vector<2x32xf32>
    %161 = math.tanh %160 : vector<2x32xf32>
    %162 = arith.mulf %157, %161 : vector<2x32xf32>
    %163 = tpu.concatenate %29, %48, %67, %86, %105, %124, %143, %162 in 0 : vector<2x32xf32>, vector<2x32xf32>, vector<2x32xf32>, vector<2x32xf32>, vector<2x32xf32>, vector<2x32xf32>, vector<2x32xf32>, vector<2x32xf32> -> vector<16x32xf32>
    %164 = arith.truncf %163 : vector<16x32xf32> to vector<16x32xbf16>
    %cst_31 = arith.constant dense<0.000000e+00> : vector<16x4xf32>
    %165 = tpu.matmul %164, %3, %cst_31 {dimension_numbers = #tpu.dot_dimension_numbers<[1], [0], [0], [1], [0, 0, 1, 1], [], []>} : vector<16x32xbf16>, vector<32x4xbf16>, vector<16x4xf32> -> vector<16x4xf32>
    %166 = vector.broadcast %4 : vector<1x4xf32> to vector<16x4xf32>
    %167 = arith.addf %165, %166 : vector<16x4xf32>
    %c0_32 = arith.constant 0 : index
    %c0_33 = arith.constant 0 : index
    %168 = vector.load %arg8[%c0_32, %c0_33] : memref<16x4xf32, #tpu.memory_space<vmem>>, vector<16x4xf32>
    tpu.vector_store %arg8[%c0_32, %c0_33], %167 {strides = array<i32>} : memref<16x4xf32, #tpu.memory_space<vmem>>, vector<16x4xf32>,
    %c0_34 = arith.constant 0 : index
    %c0_35 = arith.constant 0 : index
    %169 = vector.load %arg9[%c0_34, %c0_35] : memref<2x32xf32, #tpu.memory_space<vmem>>, vector<2x32xf32>
    tpu.vector_store %arg9[%c0_34, %c0_35], %162 {strides = array<i32>} : memref<2x32xf32, #tpu.memory_space<vmem>>, vector<2x32xf32>,
    %c0_36 = arith.constant 0 : index
    %c0_37 = arith.constant 0 : index
    %170 = vector.load %arg10[%c0_36, %c0_37] : memref<2x32xf32, #tpu.memory_space<vmem>>, vector<2x32xf32>
    tpu.vector_store %arg10[%c0_36, %c0_37], %160 {strides = array<i32>} : memref<2x32xf32, #tpu.memory_space<vmem>>, vector<2x32xf32>,
    return
  }
}

</mosaic_0001>

<bundles_post_ra>
// kernel: tpu_custom_call.1
= control target key start
LH: loop header
LB: loop body
LE: loop exit
PB: predicated region body
PF: predicated region fallthrough
CT: control target
= control target key end

     0   :  { %16 = vsyncpa [#allocation3], 0  ;;  %vm63_vm0 = vcmask 1041408   ;;  %v1115_v1 = vmov 0.0   ;;  %vm1116_vm1 = vmmov 0   ;;  %vm59_vm2 = vcmask 31744   ;;  %s1356_s0 = inlined_call_operand.vmem [shape: bf16[16,4], index: 0, kind: input, shape index: {}]   ;;  %s1357_s1 = inlined_call_operand.vmem [shape: f32[2,32], index: 1, kind: input, shape index: {}]   ;;  %s1358_s2 = inlined_call_operand.vmem [shape: f32[2,32], index: 2, kind: input, shape index: {}]   ;;  %s1359_s3 = inlined_call_operand.vmem [shape: bf16[4,128], index: 3, kind: input, shape index: {}]   ;;  %s1360_s4 = inlined_call_operand.vmem [shape: bf16[32,128], index: 4, kind: input, shape index: {}]   ;;  %s1361_s5 = inlined_call_operand.vmem [shape: f32[1,128], index: 5, kind: input, shape index: {}]   ;;  %s1362_s6 = inlined_call_operand.vmem [shape: bf16[32,4], index: 6, kind: input, shape index: {}]   ;;  %s1363_s7 = inlined_call_operand.vmem [shape: f32[1,4], index: 7, kind: input, shape index: {}]   ;;  %s1364_s8 = inlined_call_operand.vmem [shape: f32[16,4], index: 8, kind: output, shape index: {0}]   ;;  %s1365_s9 = inlined_call_operand.hbm [shape: f32[2,32], index: 9, kind: output, shape index: {1}]   ;;  %s1366_s10 = inlined_call_operand.hbm [shape: f32[2,32], index: 10, kind: output, shape index: {2}]  }
   0x1   :  { %v35_v0 = vld [vmem:[%s1359_s3] sm:$0x3]  ;;  %917 = vmatprep.subr.bf16.mxu0 %v1115_v1  ;;  %923 = vmatprep.subr.bf16.mxu1 %v1115_v1  ;;  %v1186_v3 = vld [vmem:[%s1360_s4 + $0x8] sm:$0xff]  }
   0x2   :  { %v65_v2 = vsel %vm63_vm0, %v35_v0, 0  ;;  %v1003_v4 = vld [vmem:[%s1356_s0] sm:$0xff]   ;;  %919 = vmatprep.mubr.msk.bf16.mxu0 %vm1116_vm1, %v1115_v1  ;;  %924 = vmatpush3.bf16.msra.mxu1 %v1186_v3 }
   0x3   :  { %918 = vmatpush3.bf16.msra.mxu0 %v65_v2  ;;  %v1196_v5 = vld [vmem:[%s1360_s4] sm:$0xff]   ;;  %927 = vmatprep.mubr.msk.bf16.mxu1 %vm1116_vm1, %v1115_v1 }
   0x4   :  { %v108_v6 = vld [vmem:[%s1357_s1] sm:$0x3]  ;;  %925 = vmatprep.subr.bf16.mxu1 %v1115_v1  ;;  %931 = vmatprep.subr.bf16.mxu0 %v1115_v1 }
   0x5   :  { %v110_v7 = vpack.c.bf16 %v108_v6, %v108_v6 }
   0x6   :  { %920 = vmatmul.mubr.msk.bf16.vlgmr.msra.gmra.mxu0 %vm59_vm2, %v1003_v4 }
   0x7   :  { %932 = vmatpush3.bf16.msra.mxu0 %v1186_v3  ;;  %935 = vmatprep.mubr.msk.bf16.mxu0 %vm1116_vm1, %v1115_v1 }
   0x8   :  { %17 = vsyncpa [#allocation5], 0  ;;  %926 = vmatpush3.bf16.msra.mxu1 %v1196_v5  ;;  %vm123_vm3 = vcmask 261120   ;;  %933 = vmatprep.subr.bf16.mxu0 %v1115_v1  ;;  %v863_v8 = vld [vmem:[%s1361_s5] ss:$0 sm:$0xff]  ;;  %s1117_s4 = smov 64  }
   0x9   :  { %939 = vmatprep.subr.bf16.mxu1 %v1115_v1  ;;  %v109_v21 = vld [vmem:[%s1358_s2] sm:$0x3]  ;;  %s1118_s23 = smov 32   ;;  %vm745_vm4 = vcmask 1043456   ;;  %vm747_vm5 = vcmask 1045504   ;;  %s1119_s27 = smov 96  }
   0xa   :  { %vm824_vm6 = vcmask 261126   ;;  %s1121_s29 = smov [#allocation4]  }
   0xb   :  { %928 = vmatmul.mubr.msk.bf16.vlgmr.msra.gmra.mxu1 %vm123_vm3, %v110_v7  ;;  %934 = vmatpush3.bf16.msra.mxu0 %v1196_v5  ;;  %s849_s30 = sshll.u32 %s1121_s29, 4  ;;  %s850_s30 = int_to_ptr.vmem [resolvable:$true] %s849_s30 }
   0xc   :  { %940 = vmatpush3.bf16.msra.mxu1 %v1186_v3  ;;  %943 = vmatprep.mubr.msk.bf16.mxu1 %vm1116_vm1, %v1115_v1 }
   0xd   :  { %941 = vmatprep.subr.bf16.mxu1 %v1115_v1  ;;  %947 = vmatprep.subr.bf16.mxu0 %v1115_v1 }
  0x10   :  { %942 = vmatpush3.bf16.msra.mxu1 %v1196_v5 }
  0x11   :  { %955 = vmatprep.subr.bf16.mxu1 %v1115_v1 }
  0xc6   :  { %v101_v9 = vpop.f32.mrf.mxu0 }
  0xc7   :  { %v1225_v10 = vadd.f32 %v863_v8, %v101_v9 }
  0xc8   :  { %v921_v11 = vpop.f32.mrf.mxu0 }
  0xca   :  { %v104_v12 = vpop.f32.mrf.mxu0 }
  0xcb   :  { %v1227_v13 = vadd.f32 %v863_v8, %v104_v12  ;;  %v161_v14 = vpop.f32.mrf.mxu1 }
  0xcc   :  { %v167_v15 = vadd.f32 %v161_v14, %v1225_v10  ;;  %v922_v16 = vpop.f32.mrf.mxu0 }
  0xcd   :  { %v929_v17 = vpop.f32.mrf.mxu1 }
  0xce   :  { %1007 = vtanh.f32 %v167_v15  ;;  %v869_v22 = vmul.f32 -1.442695, %v167_v15 }
  0xcf   :  { %v164_v18 = vpop.f32.mrf.mxu1 }
  0xd0   :  { %1009 = vpow2.f32 %v869_v22 }
  0xd1   :  { %v930_v19 = vpop.f32.mrf.mxu1 }
  0xdb   :  { %v1008_v20 = vpop.eup %1007 }
  0xdc   :  { %181 = vrot.lane.b32.xlu0 %v1008_v20, %s1117_s4 }
  0xdd   :  { %v1010_v23 = vpop.eup %1009 }
  0xde   :  { %v171_v24 = vadd.f32 1.0, %v1010_v23 }
  0xe0   :  { %176 = vrot.lane.b32.xlu0 %v109_v21, %s1118_s23  ;;  %1011 = vrcp.f32 %v171_v24 }
  0xed   :  { %v1012_v25 = vpop.eup %1011 }
 0x14e   :  { %v182_v26 = vpop.permute.xlu0 %181 }
 0x14f   :  { %v184_v27 = vmul.f32 %v1012_v25, %v182_v26 }
 0x151   :  { %186 = vrot.lane.b32.xlu1 %v184_v27, %s1118_s23 }
 0x152   :  { %v177_v28 = vpop.permute.xlu0 %176 }
 0x153   :  { %v179_v29 = vmul.f32 %v1012_v25, %v177_v28 }
 0x1c3   :  { %v187_v30 = vpop.permute.xlu1 %186 }
 0x1c4   :  { %v189_v31 = vadd.f32 %v187_v30, %v179_v29 }
 0x1c6   :  { %1013 = vtanh.f32 %v189_v31  ;;  %v255_v50 = vrot.slane %v189_v31, 6 }
 0x1d3   :  { %v1014_v32 = vpop.eup %1013 }
 0x1d4   :  { %192 = vrot.lane.b32.xlu1 %v1014_v32, %s1117_s4 }
 0x246   :  { %v193_v33 = vpop.permute.xlu1 %192 }
 0x247   :  { %v1237_v34 = vmul.f32 %v1012_v25, %v193_v33 }
 0x249   :  { %v196_v35 = vpack.c.bf16 %v1237_v34, %v1237_v34 }
 0x24b   :  { %198 = vrot.lane.b32.xlu0 %v196_v35, %s1118_s23 }
 0x2bd   :  { %v199_v36 = vpop.permute.xlu0 %198 }
 0x2be   :  { %936 = vmatmul.mubr.msk.bf16.vlgmr.msra.gmra.mxu0 %vm123_vm3, %v199_v36 }
 0x2bf   :  { %948 = vmatpush3.bf16.msra.mxu0 %v1186_v3  ;;  %951 = vmatprep.mubr.msk.bf16.mxu0 %vm1116_vm1, %v1115_v1 }
 0x2c0   :  { %949 = vmatprep.subr.bf16.mxu0 %v1115_v1 }
 0x2c3   :  { %950 = vmatpush3.bf16.msra.mxu0 %v1196_v5 }
 0x2c4   :  { %963 = vmatprep.subr.bf16.mxu0 %v1115_v1 }
 0x37e   :  { %v237_v37 = vpop.f32.mrf.mxu0 }
 0x37f   :  { %v244_v38 = vrot.slane %v237_v37, 6 }
 0x380   :  { %v937_v39 = vpop.f32.mrf.mxu0 }
 0x381   :  { %v246_v40 = vadd.f32 %v244_v38, %v1225_v10 }
 0x382   :  { %v240_v41 = vpop.f32.mrf.mxu0 }
 0x383   :  { %1015 = vtanh.f32 %v246_v40  ;;  %v871_v44 = vmul.f32 -1.442695, %v246_v40 }
 0x384   :  { %v938_v42 = vpop.f32.mrf.mxu0 }
 0x385   :  { %1017 = vpow2.f32 %v871_v44 }
 0x390   :  { %v1016_v43 = vpop.eup %1015 }
 0x391   :  { %259 = vrot.lane.b32.xlu1 %v1016_v43, %s1117_s4 }
 0x392   :  { %v1018_v45 = vpop.eup %1017 }
 0x393   :  { %v250_v46 = vadd.f32 1.0, %v1018_v45 }
 0x395   :  { %1019 = vrcp.f32 %v250_v46 }
 0x3a2   :  { %v1020_v47 = vpop.eup %1019 }
 0x3a3   :  { %v257_v51 = vmul.f32 %v1020_v47, %v255_v50 }
 0x403   :  { %v260_v48 = vpop.permute.xlu1 %259 }
 0x404   :  { %v262_v49 = vmul.f32 %v1020_v47, %v260_v48 }
 0x406   :  { %264 = vrot.lane.b32.xlu0 %v262_v49, %s1118_s23 }
 0x478   :  { %v265_v52 = vpop.permute.xlu0 %264 }
 0x479   :  { %v267_v53 = vadd.f32 %v265_v52, %v257_v51 }
 0x47b   :  { %1021 = vtanh.f32 %v267_v53  ;;  %v334_v14 = vrot.slane %v267_v53, 6 }
 0x488   :  { %v1022_v54 = vpop.eup %1021 }
 0x489   :  { %270 = vrot.lane.b32.xlu1 %v1022_v54, %s1117_s4 }
 0x4fb   :  { %v271_v55 = vpop.permute.xlu1 %270 }
 0x4fc   :  { %v273_v56 = vmul.f32 %v1020_v47, %v271_v55 }
 0x4fe   :  { %v274_v57 = vpack.c.bf16 %v273_v56, %v273_v56  ;;  %v744_v21 = vsel %vm63_vm0, %v1237_v34, %v273_v56 }
 0x500   :  { %v276_v58 = vrot.slane %v274_v57, 1 }
 0x502   :  { %277 = vrot.lane.b32.xlu0 %v276_v58, %s1118_s23 }
 0x574   :  { %v278_v59 = vpop.permute.xlu0 %277 }
 0x575   :  { %944 = vmatmul.mubr.msk.bf16.vlgmr.msra.gmra.mxu1 %vm123_vm3, %v278_v59 }
 0x576   :  { %956 = vmatpush3.bf16.msra.mxu1 %v1186_v3  ;;  %959 = vmatprep.mubr.msk.bf16.mxu1 %vm1116_vm1, %v1115_v1 }
 0x577   :  { %957 = vmatprep.subr.bf16.mxu1 %v1115_v1 }
 0x57a   :  { %958 = vmatpush3.bf16.msra.mxu1 %v1196_v5 }
 0x57b   :  { %971 = vmatprep.subr.bf16.mxu1 %v1115_v1 }
 0x635   :  { %v316_v60 = vpop.f32.mrf.mxu1 }
 0x636   :  { %v323_v61 = vrot.slane %v316_v60, 4 }
 0x637   :  { %v945_v62 = vpop.f32.mrf.mxu1 }
 0x638   :  { %v325_v63 = vadd.f32 %v323_v61, %v1225_v10 }
 0x639   :  { %v319_v0 = vpop.f32.mrf.mxu1 }
 0x63a   :  { %1023 = vtanh.f32 %v325_v63  ;;  %v873_v6 = vmul.f32 -1.442695, %v325_v63 }
 0x63b   :  { %v946_v2 = vpop.f32.mrf.mxu1 }
 0x63c   :  { %1025 = vpow2.f32 %v873_v6 }
 0x647   :  { %v1024_v4 = vpop.eup %1023 }
 0x648   :  { %338 = vrot.lane.b32.xlu1 %v1024_v4, %s1117_s4 }
 0x649   :  { %v1026_v7 = vpop.eup %1025 }
 0x64a   :  { %v329_v8 = vadd.f32 1.0, %v1026_v7 }
 0x64c   :  { %1027 = vrcp.f32 %v329_v8 }
 0x659   :  { %v1028_v9 = vpop.eup %1027 }
 0x65a   :  { %v336_v15 = vmul.f32 %v1028_v9, %v334_v14 }
 0x6ba   :  { %v339_v11 = vpop.permute.xlu1 %338 }
 0x6bb   :  { %v341_v12 = vmul.f32 %v1028_v9, %v339_v11 }
 0x6bd   :  { %343 = vrot.lane.b32.xlu0 %v341_v12, %s1118_s23 }
 0x72f   :  { %v344_v16 = vpop.permute.xlu0 %343 }
 0x730   :  { %v346_v17 = vadd.f32 %v344_v16, %v336_v15 }
 0x732   :  { %1029 = vtanh.f32 %v346_v17  ;;  %v413_v39 = vrot.slane %v346_v17, 6 }
 0x73f   :  { %v1030_v18 = vpop.eup %1029 }
 0x740   :  { %349 = vrot.lane.b32.xlu1 %v1030_v18, %s1117_s4 }
 0x7b2   :  { %v350_v19 = vpop.permute.xlu1 %349 }
 0x7b3   :  { %v352_v20 = vmul.f32 %v1028_v9, %v350_v19 }
 0x7b5   :  { %v353_v22 = vpack.c.bf16 %v352_v20, %v352_v20  ;;  %v746_v23 = vsel %vm745_vm4, %v744_v21, %v352_v20 }
 0x7b7   :  { %v355_v24 = vrot.slane %v353_v22, 2 }
 0x7b9   :  { %356 = vrot.lane.b32.xlu0 %v355_v24, %s1118_s23 }
 0x82b   :  { %v357_v25 = vpop.permute.xlu0 %356 }
 0x82c   :  { %952 = vmatmul.mubr.msk.bf16.vlgmr.msra.gmra.mxu0 %vm123_vm3, %v357_v25 }
 0x82d   :  { %964 = vmatpush3.bf16.msra.mxu0 %v1186_v3  ;;  %967 = vmatprep.mubr.msk.bf16.mxu0 %vm1116_vm1, %v1115_v1 }
 0x82e   :  { %965 = vmatprep.subr.bf16.mxu0 %v1115_v1 }
 0x831   :  { %966 = vmatpush3.bf16.msra.mxu0 %v1196_v5 }
 0x832   :  { %979 = vmatprep.subr.bf16.mxu0 %v1115_v1 }
 0x8ec   :  { %v395_v26 = vpop.f32.mrf.mxu0 }
 0x8ed   :  { %v402_v27 = vrot.slane %v395_v26, 2 }
 0x8ee   :  { %v953_v28 = vpop.f32.mrf.mxu0 }
 0x8ef   :  { %v404_v29 = vadd.f32 %v402_v27, %v1225_v10 }
 0x8f0   :  { %v398_v30 = vpop.f32.mrf.mxu0 }
 0x8f1   :  { %1031 = vtanh.f32 %v404_v29  ;;  %v875_v33 = vmul.f32 -1.442695, %v404_v29 }
 0x8f2   :  { %v954_v31 = vpop.f32.mrf.mxu0 }
 0x8f3   :  { %1033 = vpow2.f32 %v875_v33 }
 0x8fe   :  { %v1032_v32 = vpop.eup %1031 }
 0x8ff   :  { %417 = vrot.lane.b32.xlu1 %v1032_v32, %s1117_s4 }
 0x900   :  { %v1034_v34 = vpop.eup %1033 }
 0x901   :  { %v408_v35 = vadd.f32 1.0, %v1034_v34 }
 0x903   :  { %1035 = vrcp.f32 %v408_v35 }
 0x910   :  { %v1036_v36 = vpop.eup %1035 }
 0x911   :  { %v415_v40 = vmul.f32 %v1036_v36, %v413_v39 }
 0x971   :  { %v418_v37 = vpop.permute.xlu1 %417 }
 0x972   :  { %v420_v38 = vmul.f32 %v1036_v36, %v418_v37 }
 0x974   :  { %422 = vrot.lane.b32.xlu0 %v420_v38, %s1118_s23 }
 0x9e6   :  { %v423_v41 = vpop.permute.xlu0 %422 }
 0x9e7   :  { %v425_v10 = vadd.f32 %v423_v41, %v415_v40 }
 0x9e9   :  { %1037 = vtanh.f32 %v425_v10  ;;  %v489_v61 = vrot.slane %v425_v10, 6 }
 0x9f6   :  { %v1038_v42 = vpop.eup %1037 }
 0x9f7   :  { %428 = vrot.lane.b32.xlu1 %v1038_v42, %s1117_s4 }
 0xa69   :  { %v429_v43 = vpop.permute.xlu1 %428 }
 0xa6a   :  { %v431_v44 = vmul.f32 %v1036_v36, %v429_v43 }
 0xa6c   :  { %v432_v45 = vpack.c.bf16 %v431_v44, %v431_v44  ;;  %v1281_v46 = vsel %vm747_vm5, %v746_v23, %v431_v44 }
 0xa6e   :  { %v434_v47 = vrot.slane %v432_v45, 3 }
 0xa70   :  { %435 = vrot.lane.b32.xlu0 %v434_v47, %s1118_s23 }
 0xae2   :  { %v436_v48 = vpop.permute.xlu0 %435 }
 0xae3   :  { %960 = vmatmul.mubr.msk.bf16.vlgmr.msra.gmra.mxu1 %vm123_vm3, %v436_v48 }
 0xae4   :  { %972 = vmatpush3.bf16.msra.mxu1 %v1186_v3  ;;  %975 = vmatprep.mubr.msk.bf16.mxu1 %vm1116_vm1, %v1115_v1 }
 0xae5   :  { %973 = vmatprep.subr.bf16.mxu1 %v1115_v1 }
 0xae8   :  { %974 = vmatpush3.bf16.msra.mxu1 %v1196_v5 }
 0xae9   :  { %987 = vmatprep.subr.bf16.mxu1 %v1115_v1 }
 0xba3   :  { %v474_v49 = vpop.f32.mrf.mxu1 }
 0xba4   :  { %v480_v50 = vadd.f32 %v474_v49, %v1227_v13 }
 0xba5   :  { %v961_v51 = vpop.f32.mrf.mxu1 }
 0xba6   :  { %1039 = vtanh.f32 %v480_v50  ;;  %v877_v55 = vmul.f32 -1.442695, %v480_v50 }
 0xba7   :  { %v477_v52 = vpop.f32.mrf.mxu1 }
 0xba8   :  { %1041 = vpow2.f32 %v877_v55 }
 0xba9   :  { %v962_v53 = vpop.f32.mrf.mxu1 }
 0xbb3   :  { %v1040_v54 = vpop.eup %1039 }
 0xbb4   :  { %493 = vrot.lane.b32.xlu1 %v1040_v54, %s1117_s4 }
 0xbb5   :  { %v1042_v56 = vpop.eup %1041 }
 0xbb6   :  { %v484_v57 = vadd.f32 1.0, %v1042_v56 }
 0xbb8   :  { %1043 = vrcp.f32 %v484_v57 }
 0xbc5   :  { %v1044_v58 = vpop.eup %1043 }
 0xbc6   :  { %v491_v62 = vmul.f32 %v1044_v58, %v489_v61 }
 0xc26   :  { %v494_v59 = vpop.permute.xlu1 %493 }
 0xc27   :  { %v496_v60 = vmul.f32 %v1044_v58, %v494_v59 }
 0xc29   :  { %498 = vrot.lane.b32.xlu0 %v496_v60, %s1118_s23 }
 0xc9b   :  { %v499_v63 = vpop.permute.xlu0 %498 }
 0xc9c   :  { %v501_v0 = vadd.f32 %v499_v63, %v491_v62 }
 0xc9e   :  { %1045 = vtanh.f32 %v501_v0 }
 0xcab   :  { %v1046_v2 = vpop.eup %1045 }
 0xcac   :  { %504 = vrot.lane.b32.xlu1 %v1046_v2, %s1117_s4 }
 0xd1e   :  { %v505_v4 = vpop.permute.xlu1 %504 }
 0xd1f   :  { %v1295_v6 = vmul.f32 %v1044_v58, %v505_v4 }
 0xd21   :  { %v508_v7 = vpack.c.bf16 %v1295_v6, %v1295_v6 }
 0xd23   :  { %510 = vrot.lane.b32.xlu0 %v508_v7, %s1118_s23 }
 0xd95   :  { %v511_v8 = vpop.permute.xlu0 %510 }
 0xd96   :  { %968 = vmatmul.mubr.msk.bf16.vlgmr.msra.gmra.mxu0 %vm123_vm3, %v511_v8 }
 0xd97   :  { %980 = vmatpush3.bf16.msra.mxu0 %v1186_v3  ;;  %983 = vmatprep.mubr.msk.bf16.mxu0 %vm1116_vm1, %v1115_v1 }
 0xd98   :  { %981 = vmatprep.subr.bf16.mxu0 %v1115_v1 }
 0xd9b   :  { %982 = vmatpush3.bf16.msra.mxu0 %v1196_v5  ;;  %v567_v5 = vrot.slane %v501_v0, 6 }
 0xe56   :  { %v549_v9 = vpop.f32.mrf.mxu0 }
 0xe57   :  { %v556_v11 = vrot.slane %v549_v9, 6 }
 0xe58   :  { %v969_v12 = vpop.f32.mrf.mxu0 }
 0xe59   :  { %v558_v14 = vadd.f32 %v556_v11, %v1227_v13 }
 0xe5a   :  { %v552_v15 = vpop.f32.mrf.mxu0 }
 0xe5b   :  { %1047 = vtanh.f32 %v558_v14  ;;  %v879_v18 = vmul.f32 -1.442695, %v558_v14  ;;  %v1005_v14 = vld [vmem:[%s1362_s6 + $0x8] sm:$0xff]   ;;  %v1006_v15 = vld [vmem:[%s1362_s6] sm:$0xff]   ;;  %s1120_s6 = smov [#allocation2]  }
 0xe5c   :  { %v970_v16 = vpop.f32.mrf.mxu0  ;;  %s839_s28 = sshll.u32 %s1120_s6, 4  ;;  %s840_s28 = int_to_ptr.vmem [resolvable:$true] %s839_s28 }
 0xe5d   :  { %1049 = vpow2.f32 %v879_v18  ;;  %s1071_s11 = scalar_lea.vmem %s840_s28, 32  ;;  %p1076_p1 = scmp.lt.s32.totalorder %s840_s28, %s840_s28 }
 0xe5e   :  { %p1072_p0 = scmp.ne.s32.totalorder %s840_s28, %s1071_s11  ;;  %p1077_p2 = scmp.lt.s32.totalorder %s1071_s11, %s1071_s11 }
 0xe60   :  { %p1078_p3 = por %p1077_p2, %p1076_p1 }
 0xe62   :  { %p1079_p4 = pnand %p1078_p3, %p1072_p0 }
 0xe68   :  { %v1048_v17 = vpop.eup %1047 }
 0xe69   :  { %571 = vrot.lane.b32.xlu1 %v1048_v17, %s1117_s4 }
 0xe6a   :  { %v1050_v3 = vpop.eup %1049 }
 0xe6b   :  { %v562_v19 = vadd.f32 1.0, %v1050_v3 }
 0xe6d   :  { %1051 = vrcp.f32 %v562_v19 }
 0xe7a   :  { %v1052_v20 = vpop.eup %1051 }
 0xe7b   :  { %v569_v23 = vmul.f32 %v1052_v20, %v567_v5 }
 0xedb   :  { %v572_v21 = vpop.permute.xlu1 %571 }
 0xedc   :  { %v574_v22 = vmul.f32 %v1052_v20, %v572_v21 }
 0xede   :  { %576 = vrot.lane.b32.xlu0 %v574_v22, %s1118_s23 }
 0xf50   :  { %v577_v24 = vpop.permute.xlu0 %576 }
 0xf51   :  { %v579_v25 = vadd.f32 %v577_v24, %v569_v23 }
 0xf53   :  { %1053 = vtanh.f32 %v579_v25  ;;  %v646_v44 = vrot.slane %v579_v25, 6 }
 0xf60   :  { %v1054_v26 = vpop.eup %1053 }
 0xf61   :  { %582 = vrot.lane.b32.xlu1 %v1054_v26, %s1117_s4 }
 0xfd3   :  { %v583_v27 = vpop.permute.xlu1 %582 }
 0xfd4   :  { %v585_v28 = vmul.f32 %v1052_v20, %v583_v27 }
 0xfd6   :  { %v586_v29 = vpack.c.bf16 %v585_v28, %v585_v28  ;;  %v749_v52 = vsel %vm63_vm0, %v1295_v6, %v585_v28 }
 0xfd8   :  { %v588_v30 = vrot.slane %v586_v29, 1 }
 0xfda   :  { %589 = vrot.lane.b32.xlu0 %v588_v30, %s1118_s23 }
0x104c   :  { %v590_v31 = vpop.permute.xlu0 %589 }
0x104d   :  { %976 = vmatmul.mubr.msk.bf16.vlgmr.msra.gmra.mxu1 %vm123_vm3, %v590_v31 }
0x104e   :  { %991 = vmatprep.mubr.msk.bf16.mxu1 %vm1116_vm1, %v1115_v1  ;;  %988 = vmatpush3.bf16.msra.mxu1 %v1005_v14 }
0x104f   :  { %989 = vmatprep.subr.bf16.mxu1 %v1115_v1 }
0x1052   :  { %990 = vmatpush3.bf16.msra.mxu1 %v1006_v15 }
0x110d   :  { %v628_v32 = vpop.f32.mrf.mxu1 }
0x110e   :  { %v635_v33 = vrot.slane %v628_v32, 4 }
0x110f   :  { %v977_v34 = vpop.f32.mrf.mxu1 }
0x1110   :  { %v637_v35 = vadd.f32 %v635_v33, %v1227_v13 }
0x1111   :  { %v631_v36 = vpop.f32.mrf.mxu1 }
0x1112   :  { %1055 = vtanh.f32 %v637_v35  ;;  %v881_v39 = vmul.f32 -1.442695, %v637_v35 }
0x1113   :  { %v978_v37 = vpop.f32.mrf.mxu1 }
0x1114   :  { %1057 = vpow2.f32 %v881_v39 }
0x111f   :  { %v1056_v38 = vpop.eup %1055 }
0x1120   :  { %650 = vrot.lane.b32.xlu1 %v1056_v38, %s1117_s4 }
0x1121   :  { %v1058_v40 = vpop.eup %1057 }
0x1122   :  { %v641_v41 = vadd.f32 1.0, %v1058_v40 }
0x1124   :  { %1059 = vrcp.f32 %v641_v41 }
0x1131   :  { %v1060_v10 = vpop.eup %1059 }
0x1132   :  { %v648_v45 = vmul.f32 %v1060_v10, %v646_v44 }
0x1192   :  { %v651_v42 = vpop.permute.xlu1 %650 }
0x1193   :  { %v653_v43 = vmul.f32 %v1060_v10, %v651_v42 }
0x1195   :  { %655 = vrot.lane.b32.xlu0 %v653_v43, %s1118_s23 }
0x1207   :  { %v656_v47 = vpop.permute.xlu0 %655 }
0x1208   :  { %v658_v48 = vadd.f32 %v656_v47, %v648_v45 }
0x120a   :  { %1061 = vtanh.f32 %v658_v48  ;;  %v725_v9 = vrot.slane %v658_v48, 6 }
0x1217   :  { %v1062_v49 = vpop.eup %1061 }
0x1218   :  { %661 = vrot.lane.b32.xlu1 %v1062_v49, %s1117_s4 }
0x128a   :  { %v662_v50 = vpop.permute.xlu1 %661 }
0x128b   :  { %v664_v51 = vmul.f32 %v1060_v10, %v662_v50 }
0x128d   :  { %v665_v53 = vpack.c.bf16 %v664_v51, %v664_v51  ;;  %v750_v54 = vsel %vm745_vm4, %v749_v52, %v664_v51 }
0x128f   :  { %v667_v55 = vrot.slane %v665_v53, 2 }
0x1291   :  { %668 = vrot.lane.b32.xlu0 %v667_v55, %s1118_s23 }
0x1303   :  { %v669_v56 = vpop.permute.xlu0 %668 }
0x1304   :  { %984 = vmatmul.mubr.msk.bf16.vlgmr.msra.gmra.mxu0 %vm123_vm3, %v669_v56 }
0x13c4   :  { %v707_v57 = vpop.f32.mrf.mxu0 }
0x13c5   :  { %v714_v58 = vrot.slane %v707_v57, 2 }
0x13c6   :  { %v985_v59 = vpop.f32.mrf.mxu0 }
0x13c7   :  { %v716_v60 = vadd.f32 %v714_v58, %v1227_v13 }
0x13c8   :  { %v710_v61 = vpop.f32.mrf.mxu0 }
0x13c9   :  { %1063 = vtanh.f32 %v716_v60  ;;  %v883_v0 = vmul.f32 -1.442695, %v716_v60 }
0x13ca   :  { %v986_v62 = vpop.f32.mrf.mxu0 }
0x13cb   :  { %1065 = vpow2.f32 %v883_v0 }
0x13d6   :  { %v1064_v63 = vpop.eup %1063 }
0x13d7   :  { %729 = vrot.lane.b32.xlu1 %v1064_v63, %s1117_s4 }
0x13d8   :  { %v1066_v2 = vpop.eup %1065 }
0x13d9   :  { %v720_v4 = vadd.f32 1.0, %v1066_v2 }
0x13db   :  { %1067 = vrcp.f32 %v720_v4 }
0x13e8   :  { %v1068_v6 = vpop.eup %1067 }
0x13e9   :  { %v727_v11 = vmul.f32 %v1068_v6, %v725_v9 }
0x1449   :  { %v730_v7 = vpop.permute.xlu1 %729 }
0x144a   :  { %v732_v8 = vmul.f32 %v1068_v6, %v730_v7 }
0x144c   :  { %734 = vrot.lane.b32.xlu0 %v732_v8, %s1118_s23 }
0x14be   :  { %v735_v12 = vpop.permute.xlu0 %734 }
0x14bf   :  { %v737_v13 = vadd.f32 %v735_v12, %v727_v11 }
0x14c1   :  { %1069 = vtanh.f32 %v737_v13 }
0x14ce   :  { %v1070_v16 = vpop.eup %1069 }
0x14cf   :  { %740 = vrot.lane.b32.xlu1 %v1070_v16, %s1117_s4 }
0x1541   :  { %v741_v17 = vpop.permute.xlu1 %740 }
0x1542   :  { %v743_v18 = vmul.f32 %v1068_v6, %v741_v17 }
0x1544   :  { %821 = vrot.lane.b32.xlu1 %v743_v18, %s1118_s23  ;;  %v751_v3 = vsel %vm747_vm5, %v750_v54, %v743_v18 }
0x1545   :  { %v752_v19 = vpack.c.bf16 %v751_v3, %v1281_v46 }
0x1547   :  { %760 = vrot.lane.b32.xlu0 %v752_v19, %s1118_s23 }
0x154b   :  { %827 = vrot.lane.b32.xlu0 %v737_v13, %s1119_s27 }
0x15b6   :  { %v822_v20 = vpop.permute.xlu1 %821 }
0x15b7   :  { %825 = vst.msk [vmem:[#allocation2 - $0x6] sm:$0xc0] %vm824_vm6, %v822_v20 }
0x15b9   :  { %v761_v21 = vpop.permute.xlu0 %760 }
0x15ba   :  { %992 = vmatmul.mubr.msk.bf16.vlgmr.msra.gmra.mxu1 %vm123_vm3, %v761_v21 }
0x15bd   :  { %v828_v1 = vpop.permute.xlu0 %827 }
0x15be   :  { %830 = vst.msk [vmem:[#allocation4 - $0x6] sm:$0xc0] %vm824_vm6, %v828_v1 }
0x15bf   :  { %1082 = shalt.err (!%p1079_p4)
}
0x15c0   :  { %842 = dma.vmem_to_hbm [thread:$0]  %s840_s28, 32, %s1365_s9, [#allocation3]  }
0x15c1   :  { %s1091_s14 = scalar_lea.vmem %s850_s30, 32  ;;  %p1096_p6 = scmp.lt.s32.totalorder %s850_s30, %s850_s30 }
0x15c2   :  { %p1092_p5 = scmp.ne.s32.totalorder %s850_s30, %s1091_s14  ;;  %p1097_p7 = scmp.lt.s32.totalorder %s1091_s14, %s1091_s14 }
0x15c4   :  { %p1098_p8 = por %p1097_p7, %p1096_p6 }
0x15c6   :  { %p1099_p9 = pnand %p1098_p8, %p1092_p5 }
0x15c8   :  { %1102 = shalt.err (!%p1099_p9)
}
0x15c9   :  { %852 = dma.vmem_to_hbm [thread:$0]  %s850_s30, 32, %s1366_s10, [#allocation5]   ;;  %v884_v46 = vld [vmem:[%s1363_s7] ss:$0 sm:$0xff] }
0x167a   :  { %v811_v22 = vpop.f32.mrf.mxu1 }
0x167b   :  { %v812_v5 = vadd.f32 %v884_v46, %v811_v22 }
0x167c   :  { %v993_v23 = vpop.f32.mrf.mxu1 }
0x167d   :  { %818 = vst.msk [vmem:[%s1364_s8] sm:$0xff] %vm59_vm2, %v812_v5 }
0x167e   :  { %v814_v24 = vpop.f32.mrf.mxu1 }
0x167f   :  { %v815_v25 = vadd.f32 %v884_v46, %v814_v24 }
0x1680   :  { %v994_v26 = vpop.f32.mrf.mxu1 }
0x1681   :  { %819 = vst.msk [vmem:[%s1364_s8 + $0x8] sm:$0xff] %vm59_vm2, %v815_v25 }
0x1682   :  { %1111 = dma.done.wait [#allocation3], 32  }
0x1683   :  { %1112 = vsyncadd [#allocation3], 4294967264 }
0x1684   :  { %1113 = dma.done.wait [#allocation5], 32  }
0x1685   :  { %1114 = vsyncadd [#allocation5], 4294967264 }
0x1686   :  { %861 = vsyncpa [#allocation3], 1 }
0x1687   :  { %862 = vsyncpa [#allocation5], 1 }

</bundles_post_ra>
